<compile_context>
chip_gen: v7x
topology: tpu7x:2x2x1
jax: 0.10.0
libtpu: 0.0.40
codegen_flags: <defaults>
</compile_context>

<pallas_src>
import functools

import jax
import jax.numpy as jnp
from jax.experimental import pallas as pl
from jax.experimental.pallas import tpu as pltpu


def _interp_matrix(out_size: int, in_size: int) -> jnp.ndarray:
    """Row-stochastic bilinear (align_corners=True) interpolation matrix."""
    if out_size == 1:
        src = jnp.zeros((1,), jnp.float32)
    else:
        src = jnp.arange(out_size, dtype=jnp.float32) * (
            (in_size - 1) / (out_size - 1)
        )
    i0 = jnp.clip(jnp.floor(src).astype(jnp.int32), 0, in_size - 1)
    i1 = jnp.clip(i0 + 1, 0, in_size - 1)
    t = src - i0.astype(jnp.float32)
    rows = jnp.arange(out_size)
    w = jnp.zeros((out_size, in_size), jnp.float32)
    w = w.at[rows, i0].add(1.0 - t)
    w = w.at[rows, i1].add(t)
    return w


def _block_diag(m: jnp.ndarray, b: int) -> jnp.ndarray:
    """Tile matrix `m` (R, S) into a (b*R, b*S) block-diagonal matrix."""
    r, s = m.shape
    eye = jnp.eye(b, dtype=m.dtype)
    return jnp.einsum("ij,rs->irjs", eye, m).reshape(b * r, b * s)


def _pick_block(nc, h_in, w_in, h_out, w_out, itemsize,
                budget_bytes=8 * 2**20) -> int:
    """Largest divisor of NC whose working set fits the VMEM budget.

    Every BlockSpec input is double-buffered by the Pallas pipeline, so the
    weight matrices and the per-step input/target tiles are counted twice;
    the scratch accumulators are single-buffered.
    """
    best = 1
    for b in range(1, nc + 1):
        if nc % b:
            continue
        whbd = 2 * (b * h_out) * (b * h_in) * 4      # block-diagonal Wh (f32)
        wwt = 2 * w_in * w_out * 4                   # Ww^T (f32)
        acc = 2 * (b * h_out) * w_out * 4            # g / g*g accumulators
        xin = 2 * b * h_in * w_in * itemsize         # double-buffered input
        tin = 2 * b * h_out * w_out * itemsize       # double-buffered target
        if whbd + wwt + acc + xin + tin <= budget_bytes:
            best = b
    return best


def _silog_kernel(x_ref, t_ref, whbd_ref, wwt_ref, o_ref,
                  g_acc, g2_acc, *, n_elems: float):
    step = pl.program_id(0)

    @pl.when(step == 0)
    def _():
        g_acc[...] = jnp.zeros_like(g_acc)
        g2_acc[...] = jnp.zeros_like(g2_acc)

    b, h_in, w_in = x_ref.shape
    bh_out, w_out = g_acc.shape

    # Cast inside the kernel: HBM carries the native dtype, math runs in f32.
    # (b, h_in) -> (b*h_in) merge is sublane-contiguous when h_in % 8 == 0.
    xb = x_ref[...].reshape(b * h_in, w_in).astype(jnp.float32)

    # Bilinear resize of B channel slices as two wide MXU matmuls:
    #   (B*H_out, B*H_in) @ (B*H_in, W_in) -> (B*H_out, W_in)
    #   (B*H_out, W_in)   @ (W_in,  W_out) -> (B*H_out, W_out)
    tmp = jnp.dot(whbd_ref[...], xb, preferred_element_type=jnp.float32)
    interp = jnp.dot(tmp, wwt_ref[...], preferred_element_type=jnp.float32)

    tb = t_ref[...].reshape(bh_out, w_out).astype(jnp.float32)
    g = jnp.log(interp) - jnp.log(tb)

    # Hot loop: elementwise VPU accumulation only; reductions are deferred.
    g_acc[...] += g
    g2_acc[...] += g * g

    @pl.when(step == pl.num_programs(0) - 1)
    def _():
        cnt = jnp.float32(n_elems)
        s1 = jnp.sum(g_acc[...])
        s2 = jnp.sum(g2_acc[...])
        mean = s1 / cnt
        # torch.var defaults to the unbiased estimator (ddof=1).  Elementwise
        # tile accumulation + single tree reduction keeps the partial sums
        # accurate before the E[g^2] - E[g]^2 combine.
        var = (s2 - cnt * mean * mean) / (cnt - 1.0)
        dg = var + 0.15 * mean * mean
        o_ref[...] = jnp.zeros_like(o_ref) + jnp.sqrt(dg)


def silog_loss(inp: jnp.ndarray, target: jnp.ndarray) -> jnp.ndarray:
    """SILogLoss.forward(input, target, mask=None, interpolate=True)."""
    n, c, h_in, w_in = inp.shape
    nt, ct, h_out, w_out = target.shape
    assert (n, c) == (nt, ct)
    nc = n * c

    # Free reshapes (merge leading dims); no dtype change, no extra HBM copy.
    x2 = inp.reshape(nc, h_in, w_in)
    t2 = target.reshape(nc, h_out, w_out)

    blk = _pick_block(nc, h_in, w_in, h_out, w_out,
                      jnp.dtype(inp.dtype).itemsize)
    grid = nc // blk

    wh = _interp_matrix(h_out, h_in)                 # (H_out, H_in)
    whbd = _block_diag(wh, blk)                      # (B*H_out, B*H_in)
    ww_t = _interp_matrix(w_out, w_in).T             # (W_in, W_out)

    n_elems = float(nc * h_out * w_out)
    kernel = functools.partial(_silog_kernel, n_elems=n_elems)

    itemsize = jnp.dtype(inp.dtype).itemsize
    t_itemsize = jnp.dtype(target.dtype).itemsize
    cost = pl.CostEstimate(
        flops=(2 * grid * ((blk * h_out) * (blk * h_in) * w_in
                           + (blk * h_out) * w_in * w_out)
               + 6 * nc * h_out * w_out),
        transcendentals=2 * nc * h_out * w_out,
        bytes_accessed=(inp.size * itemsize + target.size * t_itemsize
                        + whbd.size * 4 + ww_t.size * 4 + 4),
    )

    out = pl.pallas_call(
        kernel,
        out_shape=jax.ShapeDtypeStruct((1, 1), jnp.float32),
        grid_spec=pltpu.PrefetchScalarGridSpec(
            num_scalar_prefetch=0,
            grid=(grid,),
            in_specs=[
                pl.BlockSpec((blk, h_in, w_in), lambda i: (i, 0, 0)),
                pl.BlockSpec((blk, h_out, w_out), lambda i: (i, 0, 0)),
                pl.BlockSpec((blk * h_out, blk * h_in), lambda i: (0, 0)),
                pl.BlockSpec((w_in, w_out), lambda i: (0, 0)),
            ],
            out_specs=pl.BlockSpec((1, 1), lambda i: (0, 0)),
            scratch_shapes=[
                pltpu.VMEM((blk * h_out, w_out), jnp.float32),   # sum of g
                pltpu.VMEM((blk * h_out, w_out), jnp.float32),   # sum of g*g
            ],
        ),
        compiler_params=pltpu.CompilerParams(
            dimension_semantics=("arbitrary",),
            vmem_limit_bytes=32 * 1024 * 1024,
        ),
        cost_estimate=cost,
    )(x2, t2, whbd, ww_t)

    return out[0, 0]


def _silog_loss_ref(inp, target):
    """Pure-JAX reference of the same forward pass (for verification)."""
    h_out, w_out = target.shape[-2:]
    h_in, w_in = inp.shape[-2:]
    wh = _interp_matrix(h_out, h_in)
    ww = _interp_matrix(w_out, w_in)
    interp = jnp.einsum("oh,nchw,pw->ncop", wh, inp.astype(jnp.float32), ww)
    g = jnp.log(interp) - jnp.log(target.astype(jnp.float32))
    dg = jnp.var(g, ddof=1) + 0.15 * jnp.mean(g) ** 2
    return jnp.sqrt(dg)


if __name__ == "__main__":
    key = jax.random.PRNGKey(0)
    k1, k2 = jax.random.split(key)

    # Small shapes: prediction at half resolution of the target depth map.
    N, C, H_in, W_in = 2, 4, 8, 8
    H_out, W_out = 16, 16

    # Strictly positive inputs/targets (log is applied to both).
    inp = jax.random.uniform(k1, (N, C, H_in, W_in), jnp.float32,
                             minval=0.1, maxval=2.0)
    target = jax.random.uniform(k2, (N, C, H_out, W_out), jnp.float32,
                                minval=0.1, maxval=2.0)

    loss = silog_loss(inp, target)
    jax.block_until_ready(loss)

    ref = _silog_loss_ref(inp, target)
    assert jnp.isfinite(loss), "non-finite loss"
    assert jnp.allclose(loss, ref, rtol=1e-5, atol=1e-5), (loss, ref)

    print("KERNEL_OK")
</pallas_src>

<mosaic_0001>
module attributes {stable_mosaic.version = 11 : i64} {
  func.func @_silog_kernel(%arg0: i32, %arg1: memref<8x8x8xf32, #tpu.memory_space<vmem>>, %arg2: memref<8x16x16xf32, #tpu.memory_space<vmem>>, %arg3: memref<128x64xf32, #tpu.memory_space<vmem>>, %arg4: memref<8x16xf32, #tpu.memory_space<vmem>>, %arg5: memref<1x1xf32, #tpu.memory_space<vmem>>, %arg6: memref<128x16xf32, #tpu.memory_space<vmem>>, %arg7: memref<128x16xf32, #tpu.memory_space<vmem>>) attributes {dimension_semantics = [#tpu.dimension_semantics<arbitrary>], iteration_bounds = array<i64: 1>, scalar_prefetch = 0 : i64, scratch_operands = 2 : i64, tpu.core_type = #tpu.core_type<tc>, window_params = [{transform_indices = @transform_0, window_bounds = array<i64: 8, 8, 8>}, {transform_indices = @transform_1, window_bounds = array<i64: 8, 16, 16>}, {pipeline_mode = #tpu.pipeline_mode<synchronous>, transform_indices = @transform_2, window_bounds = array<i64: 128, 64>}, {pipeline_mode = #tpu.pipeline_mode<synchronous>, transform_indices = @transform_3, window_bounds = array<i64: 8, 16>}, {pipeline_mode = #tpu.pipeline_mode<synchronous>, transform_indices = @transform_4, window_bounds = array<i64: 1, 1>}]} {
    %c0_i32 = arith.constant 0 : i32
    %0 = arith.cmpi eq, %arg0, %c0_i32 : i32
    %1 = arith.extui %0 : i1 to i32
    %c0_i32_0 = arith.constant 0 : i32
    %2 = arith.cmpi ne, %1, %c0_i32_0 : i32
    scf.if %2 {
      %cst_21 = arith.constant 0.000000e+00 : f32
      %24 = vector.broadcast %cst_21 : f32 to vector<128x16xf32>
      %c0_22 = arith.constant 0 : index
      %c0_23 = arith.constant 0 : index
      %25 = vector.load %arg6[%c0_22, %c0_23] : memref<128x16xf32, #tpu.memory_space<vmem>>, vector<128x16xf32>
      tpu.vector_store %arg6[%c0_22, %c0_23], %24 {strides = array<i32>} : memref<128x16xf32, #tpu.memory_space<vmem>>, vector<128x16xf32>,
      %cst_24 = arith.constant 0.000000e+00 : f32
      %26 = vector.broadcast %cst_24 : f32 to vector<128x16xf32>
      %c0_25 = arith.constant 0 : index
      %c0_26 = arith.constant 0 : index
      %27 = vector.load %arg7[%c0_25, %c0_26] : memref<128x16xf32, #tpu.memory_space<vmem>>, vector<128x16xf32>
      tpu.vector_store %arg7[%c0_25, %c0_26], %26 {strides = array<i32>} : memref<128x16xf32, #tpu.memory_space<vmem>>, vector<128x16xf32>,
    } else {
    }
    %c0 = arith.constant 0 : index
    %c0_1 = arith.constant 0 : index
    %c0_2 = arith.constant 0 : index
    %3 = vector.load %arg1[%c0, %c0_1, %c0_2] : memref<8x8x8xf32, #tpu.memory_space<vmem>>, vector<8x8x8xf32>
    %4 = vector.shape_cast %3 : vector<8x8x8xf32> to vector<64x8xf32>
    %c0_3 = arith.constant 0 : index
    %c0_4 = arith.constant 0 : index
    %5 = vector.load %arg3[%c0_3, %c0_4] : memref<128x64xf32, #tpu.memory_space<vmem>>, vector<128x64xf32>
    %cst = arith.constant dense<0.000000e+00> : vector<128x8xf32>
    %6 = tpu.matmul %5, %4, %cst {dimension_numbers = #tpu.dot_dimension_numbers<[1], [0], [0], [1], [0, 0, 1, 1], [], []>} : vector<128x64xf32>, vector<64x8xf32>, vector<128x8xf32> -> vector<128x8xf32>
    %c0_5 = arith.constant 0 : index
    %c0_6 = arith.constant 0 : index
    %7 = vector.load %arg4[%c0_5, %c0_6] : memref<8x16xf32, #tpu.memory_space<vmem>>, vector<8x16xf32>
    %cst_7 = arith.constant dense<0.000000e+00> : vector<128x16xf32>
    %8 = tpu.matmul %6, %7, %cst_7 {dimension_numbers = #tpu.dot_dimension_numbers<[1], [0], [0], [1], [0, 0, 1, 1], [], []>} : vector<128x8xf32>, vector<8x16xf32>, vector<128x16xf32> -> vector<128x16xf32>
    %c0_8 = arith.constant 0 : index
    %c0_9 = arith.constant 0 : index
    %c0_10 = arith.constant 0 : index
    %9 = vector.load %arg2[%c0_8, %c0_9, %c0_10] : memref<8x16x16xf32, #tpu.memory_space<vmem>>, vector<8x16x16xf32>
    %10 = vector.shape_cast %9 : vector<8x16x16xf32> to vector<128x16xf32>
    %11 = math.log %8 : vector<128x16xf32>
    %12 = math.log %10 : vector<128x16xf32>
    %13 = arith.subf %11, %12 : vector<128x16xf32>
    %c0_11 = arith.constant 0 : index
    %c0_12 = arith.constant 0 : index
    %14 = vector.load %arg6[%c0_11, %c0_12] : memref<128x16xf32, #tpu.memory_space<vmem>>, vector<128x16xf32>
    %15 = arith.addf %14, %13 : vector<128x16xf32>
    %c0_13 = arith.constant 0 : index
    %c0_14 = arith.constant 0 : index
    %16 = vector.load %arg6[%c0_13, %c0_14] : memref<128x16xf32, #tpu.memory_space<vmem>>, vector<128x16xf32>
    tpu.vector_store %arg6[%c0_13, %c0_14], %15 {strides = array<i32>} : memref<128x16xf32, #tpu.memory_space<vmem>>, vector<128x16xf32>,
    %c0_15 = arith.constant 0 : index
    %c0_16 = arith.constant 0 : index
    %17 = vector.load %arg7[%c0_15, %c0_16] : memref<128x16xf32, #tpu.memory_space<vmem>>, vector<128x16xf32>
    %18 = arith.mulf %13, %13 : vector<128x16xf32>
    %19 = arith.addf %17, %18 : vector<128x16xf32>
    %c0_17 = arith.constant 0 : index
    %c0_18 = arith.constant 0 : index
    %20 = vector.load %arg7[%c0_17, %c0_18] : memref<128x16xf32, #tpu.memory_space<vmem>>, vector<128x16xf32>
    tpu.vector_store %arg7[%c0_17, %c0_18], %19 {strides = array<i32>} : memref<128x16xf32, #tpu.memory_space<vmem>>, vector<128x16xf32>,
    %c0_i32_19 = arith.constant 0 : i32
    %21 = arith.cmpi eq, %arg0, %c0_i32_19 : i32
    %22 = arith.extui %21 : i1 to i32
    %c0_i32_20 = arith.constant 0 : i32
    %23 = arith.cmpi ne, %22, %c0_i32_20 : i32
    scf.if %23 {
      %c0_21 = arith.constant 0 : index
      %c0_22 = arith.constant 0 : index
      %24 = vector.load %arg6[%c0_21, %c0_22] : memref<128x16xf32, #tpu.memory_space<vmem>>, vector<128x16xf32>
      %25 = vector.shape_cast %24 : vector<128x16xf32> to vector<1x128x16xf32>
      %cst_23 = arith.constant dense<0.000000e+00> : vector<1xf32>
      %26 = vector.multi_reduction <add>, %25, %cst_23 [1, 2] : vector<1x128x16xf32> to vector<1xf32>
      %27 = vector.shape_cast %26 : vector<1xf32> to vector<1x1x1xf32>
      %28 = vector.extract %27[0, 0, 0] : f32 from vector<1x1x1xf32>
      %c0_24 = arith.constant 0 : index
      %c0_25 = arith.constant 0 : index
      %29 = vector.load %arg7[%c0_24, %c0_25] : memref<128x16xf32, #tpu.memory_space<vmem>>, vector<128x16xf32>
      %30 = vector.shape_cast %29 : vector<128x16xf32> to vector<1x128x16xf32>
      %cst_26 = arith.constant dense<0.000000e+00> : vector<1xf32>
      %31 = vector.multi_reduction <add>, %30, %cst_26 [1, 2] : vector<1x128x16xf32> to vector<1xf32>
      %32 = vector.shape_cast %31 : vector<1xf32> to vector<1x1x1xf32>
      %33 = vector.extract %32[0, 0, 0] : f32 from vector<1x1x1xf32>
      %cst_27 = arith.constant 2.048000e+03 : f32
      %34 = arith.divf %28, %cst_27 : f32
      %cst_28 = arith.constant 2.048000e+03 : f32
      %35 = arith.mulf %cst_28, %34 : f32
      %36 = arith.mulf %35, %34 : f32
      %37 = arith.subf %33, %36 : f32
      %cst_29 = arith.constant 2.048000e+03 : f32
      %cst_30 = arith.constant 1.000000e+00 : f32
      %38 = arith.subf %cst_29, %cst_30 : f32
      %39 = arith.divf %37, %38 : f32
      %cst_31 = arith.constant 1.500000e-01 : f32
      %40 = arith.mulf %cst_31, %34 : f32
      %41 = arith.mulf %40, %34 : f32
      %42 = arith.addf %39, %41 : f32
      %cst_32 = arith.constant 0.000000e+00 : f32
      %43 = vector.broadcast %cst_32 : f32 to vector<1x1xf32>
      %44 = math.sqrt %42 : f32
      %45 = vector.broadcast %44 : f32 to vector<1x1xf32>
      %46 = arith.addf %43, %45 : vector<1x1xf32>
      %c0_33 = arith.constant 0 : index
      %c0_34 = arith.constant 0 : index
      %47 = vector.load %arg5[%c0_33, %c0_34] : memref<1x1xf32, #tpu.memory_space<vmem>>, vector<1x1xf32>
      tpu.vector_store %arg5[%c0_33, %c0_34], %46 {strides = array<i32>} : memref<1x1xf32, #tpu.memory_space<vmem>>, vector<1x1xf32>,
    } else {
    }
    return
  }
  func.func @transform_0(%arg0: i32) -> (i32, i32, i32) {
    %c0_i32 = arith.constant 0 : i32
    %c0_i32_0 = arith.constant 0 : i32
    %c0_i32_1 = arith.constant 0 : i32
    return %arg0, %c0_i32, %c0_i32_0 : i32, i32, i32
  }
  func.func @transform_1(%arg0: i32) -> (i32, i32, i32) {
    %c0_i32 = arith.constant 0 : i32
    %c0_i32_0 = arith.constant 0 : i32
    %c0_i32_1 = arith.constant 0 : i32
    return %arg0, %c0_i32, %c0_i32_0 : i32, i32, i32
  }
  func.func @transform_2(%arg0: i32) -> (i32, i32) {
    %c0_i32 = arith.constant 0 : i32
    %c0_i32_0 = arith.constant 0 : i32
    %c0_i32_1 = arith.constant 0 : i32
    return %c0_i32, %c0_i32_0 : i32, i32
  }
  func.func @transform_3(%arg0: i32) -> (i32, i32) {
    %c0_i32 = arith.constant 0 : i32
    %c0_i32_0 = arith.constant 0 : i32
    %c0_i32_1 = arith.constant 0 : i32
    return %c0_i32, %c0_i32_0 : i32, i32
  }
  func.func @transform_4(%arg0: i32) -> (i32, i32) {
    %c0_i32 = arith.constant 0 : i32
    %c0_i32_0 = arith.constant 0 : i32
    %c0_i32_1 = arith.constant 0 : i32
    return %c0_i32, %c0_i32_0 : i32, i32
  }
}

</mosaic_0001>

<bundles_post_ra>
// kernel: tpu_custom_call.1
= control target key start
LH: loop header
LB: loop body
LE: loop exit
PB: predicated region body
PF: predicated region fallthrough
CT: control target
= control target key end

     0   :  { %vm79_vm0 = vcmask 523264   ;;  %s1401_s0 = inlined_call_operand.vmem [shape: f32[8,8,8], index: 0, kind: input, shape index: {}]   ;;  %s1402_s1 = inlined_call_operand.vmem [shape: f32[8,16,16], index: 1, kind: input, shape index: {}]   ;;  %s1403_s2 = inlined_call_operand.vmem [shape: f32[128,64], index: 2, kind: input, shape index: {}]   ;;  %s1404_s3 = inlined_call_operand.vmem [shape: f32[8,16], index: 3, kind: input, shape index: {}]   ;;  %s1405_s4 = inlined_call_operand.hbm [shape: f32[1,1], index: 4, kind: output, shape index: {}]  }
   0x1   :  { %v55_v0 = vld [vmem:[%s1401_s0] sm:$0xff]  ;;  %v56_v1 = vld [vmem:[%s1401_s0 + $0x8] sm:$0xff]  ;;  %v57_v2 = vld [vmem:[%s1401_s0 + $0x10] sm:$0xff] }
   0x2   :  { %v970_v3 = vpack.c.bf16 %v56_v1, %v55_v0  ;;  %v58_v4 = vld [vmem:[%s1401_s0 + $0x18] sm:$0xff]  ;;  %v59_v6 = vld [vmem:[%s1401_s0 + $0x20] sm:$0xff]  ;;  %v60_v7 = vld [vmem:[%s1401_s0 + $0x28] sm:$0xff] }
   0x3   :  { %v974_v5 = vpack.c.bf16 %v58_v4, %v57_v2  ;;  %v63_v8 = vld [vmem:[%s1403_s2] sm:$0xff]  ;;  %v978_v9 = vpack.c.bf16 %v60_v7, %v59_v6  ;;  %v61_v10 = vld [vmem:[%s1401_s0 + $0x30] sm:$0xff]  ;;  %v62_v11 = vld [vmem:[%s1401_s0 + $0x38] sm:$0xff] }
   0x4   :  { %971 = vmatprep.subr.bf16.mxu0 %v970_v3  ;;  %920 = vmatprep.mubr.msk.f32.mxu0 %vm79_vm0, %v63_v8 }
   0x5   :  { %973 = vmatpush3.bf16.msra.mxu0 %v970_v3 }
   0x6   :  { %975 = vmatprep.subr.bf16.mxu0 %v974_v5 }
   0x9   :  { %977 = vmatpush3.bf16.msra.mxu0 %v974_v5 }
   0xa   :  { %9 = vsyncpa [#allocation5], 0  ;;  %979 = vmatprep.subr.bf16.mxu0 %v978_v9  ;;  %v982_v12 = vpack.c.bf16 %v62_v11, %v61_v10  ;;  %v64_v13 = vld [vmem:[%s1403_s2 + $0x8] sm:$0xff]  ;;  %v65_v14 = vld [vmem:[%s1403_s2 + $0x10] sm:$0xff]  ;;  %vm22_vm1 = vcmask 130048   ;;  %v1084_v29 = vmov 0.0  }
   0xb   :  { %v66_v15 = vld [vmem:[%s1403_s2 + $0x18] sm:$0xff]  ;;  %v67_v16 = vld [vmem:[%s1403_s2 + $0x20] sm:$0xff]  ;;  %v68_v17 = vld [vmem:[%s1403_s2 + $0x28] sm:$0xff]  ;;  %24 = vst.msk [vmem:[#allocation2 + $0x8] sm:$0xff] %vm22_vm1, %v1084_v29  ;;  %vm274_vm2 = vcmask 64512   ;;  %s1085_s21 = smov [#allocation4]  }
   0xc   :  { %v69_v18 = vld [vmem:[%s1403_s2 + $0x30] sm:$0xff]  ;;  %v70_v19 = vld [vmem:[%s1403_s2 + $0x38] sm:$0xff]  ;;  %v71_v20 = vld [vmem:[%s1403_s2 + $0x40] sm:$0xff]  ;;  %40 = vst.msk [vmem:[#allocation3 + $0x8] sm:$0xff] %vm22_vm1, %v1084_v29  ;;  %s823_s22 = sshll.u32 %s1085_s21, 4  ;;  %vm815_vm5 = vcmask 0   ;;  %s824_s22 = int_to_ptr.vmem [resolvable:$true] %s823_s22 }
   0xd   :  { %981 = vmatpush3.bf16.msra.mxu0 %v978_v9  ;;  %v72_v21 = vld [vmem:[%s1403_s2 + $0x48] sm:$0xff]  ;;  %v73_v22 = vld [vmem:[%s1403_s2 + $0x50] sm:$0xff]  ;;  %v74_v23 = vld [vmem:[%s1403_s2 + $0x58] sm:$0xff]  ;;  %23 = vst.msk [vmem:[#allocation2] sm:$0xff] %vm22_vm1, %v1084_v29  ;;  %s1060_s24 = scalar_lea.vmem %s824_s22, 16  ;;  %s1064_s25 = scalar_lea.vmem %s824_s22, 32 }
   0xe   :  { %983 = vmatprep.subr.bf16.mxu0 %v982_v12  ;;  %v75_v24 = vld [vmem:[%s1403_s2 + $0x60] sm:$0xff]  ;;  %v76_v25 = vld [vmem:[%s1403_s2 + $0x68] sm:$0xff]  ;;  %v77_v26 = vld [vmem:[%s1403_s2 + $0x70] sm:$0xff]  ;;  %25 = vst.msk [vmem:[#allocation2 + $0x10] sm:$0xff] %vm22_vm1, %v1084_v29  ;;  %p1061_p0 = scmp.ne.s32.totalorder %s824_s22, %s1060_s24  ;;  %p1065_p1 = scmp.lt.s32.totalorder %s824_s22, %s824_s22 }
   0xf   :  { %v78_v27 = vld [vmem:[%s1403_s2 + $0x78] sm:$0xff]  ;;  %v273_v28 = vld [vmem:[%s1404_s3] sm:$0xff]  ;;  %26 = vst.msk [vmem:[#allocation2 + $0x18] sm:$0xff] %vm22_vm1, %v1084_v29  ;;  %27 = vst.msk [vmem:[#allocation2 + $0x20] sm:$0xff] %vm22_vm1, %v1084_v29  ;;  %p1066_p2 = scmp.lt.s32.totalorder %s1064_s25, %s1060_s24 }
  0x10   :  { %944 = vmatprep.subr.mxu1 %v273_v28  ;;  %28 = vst.msk [vmem:[#allocation2 + $0x28] sm:$0xff] %vm22_vm1, %v1084_v29  ;;  %29 = vst.msk [vmem:[#allocation2 + $0x30] sm:$0xff] %vm22_vm1, %v1084_v29  ;;  %v469_v46 = vld [vmem:[%s1402_s1 + $0x8] sm:$0xff]  ;;  %v468_v47 = vld [vmem:[%s1402_s1] sm:$0xff] }
  0x11   :  { %985 = vmatpush3.bf16.msra.mxu0 %v982_v12  ;;  %945 = vmatpush3.msra.mxu1 %v273_v28  ;;  %30 = vst.msk [vmem:[#allocation2 + $0x38] sm:$0xff] %vm22_vm1, %v1084_v29  ;;  %31 = vst.msk [vmem:[#allocation2 + $0x40] sm:$0xff] %vm22_vm1, %v1084_v29  ;;  %v471_v48 = vld [vmem:[%s1402_s1 + $0x18] sm:$0xff]  ;;  %994 = vlog2.f32 %v469_v46  ;;  %v470_v49 = vld [vmem:[%s1402_s1 + $0x10] sm:$0xff]  ;;  %p1067_p3 = por %p1066_p2, %p1065_p1 }
  0x12   :  { %32 = vst.msk [vmem:[#allocation2 + $0x48] sm:$0xff] %vm22_vm1, %v1084_v29  ;;  %33 = vst.msk [vmem:[#allocation2 + $0x50] sm:$0xff] %vm22_vm1, %v1084_v29  ;;  %996 = vlog2.f32 %v468_v47  ;;  %v473_v50 = vld [vmem:[%s1402_s1 + $0x28] sm:$0xff]  ;;  %v472_v51 = vld [vmem:[%s1402_s1 + $0x20] sm:$0xff] }
  0x13   :  { %34 = vst.msk [vmem:[#allocation2 + $0x58] sm:$0xff] %vm22_vm1, %v1084_v29  ;;  %35 = vst.msk [vmem:[#allocation2 + $0x60] sm:$0xff] %vm22_vm1, %v1084_v29  ;;  %998 = vlog2.f32 %v471_v48  ;;  %v475_v52 = vld [vmem:[%s1402_s1 + $0x38] sm:$0xff]  ;;  %v474_v53 = vld [vmem:[%s1402_s1 + $0x30] sm:$0xff]  ;;  %p1068_p4 = pnand %p1067_p3, %p1061_p0 }
  0x14   :  { %921 = vmatmul.mubr.msk.f32.vlgmr.msra.gmra.mrb[0].mxu0 %vm79_vm0, %v64_v13  ;;  %36 = vst.msk [vmem:[#allocation2 + $0x68] sm:$0xff] %vm22_vm1, %v1084_v29  ;;  %37 = vst.msk [vmem:[#allocation2 + $0x70] sm:$0xff] %vm22_vm1, %v1084_v29  ;;  %1000 = vlog2.f32 %v470_v49  ;;  %v477_v54 = vld [vmem:[%s1402_s1 + $0x48] sm:$0xff]  ;;  %v476_v56 = vld [vmem:[%s1402_s1 + $0x40] sm:$0xff] }
  0x15   :  { %923 = vmatprep.mubr.msk.f32.mxu0 %vm79_vm0, %v65_v14  ;;  %38 = vst.msk [vmem:[#allocation2 + $0x78] sm:$0xff] %vm22_vm1, %v1084_v29  ;;  %39 = vst.msk [vmem:[#allocation3] sm:$0xff] %vm22_vm1, %v1084_v29  ;;  %1002 = vlog2.f32 %v473_v50  ;;  %v479_v58 = vld [vmem:[%s1402_s1 + $0x58] sm:$0xff]  ;;  %v478_v63 = vld [vmem:[%s1402_s1 + $0x50] sm:$0xff] }
  0x16   :  { %41 = vst.msk [vmem:[#allocation3 + $0x10] sm:$0xff] %vm22_vm1, %v1084_v29  ;;  %42 = vst.msk [vmem:[#allocation3 + $0x18] sm:$0xff] %vm22_vm1, %v1084_v29  ;;  %1004 = vlog2.f32 %v472_v51  ;;  %v481_v2 = vld [vmem:[%s1402_s1 + $0x68] sm:$0xff]  ;;  %v480_v7 = vld [vmem:[%s1402_s1 + $0x60] sm:$0xff] }
  0x17   :  { %43 = vst.msk [vmem:[#allocation3 + $0x20] sm:$0xff] %vm22_vm1, %v1084_v29  ;;  %44 = vst.msk [vmem:[#allocation3 + $0x28] sm:$0xff] %vm22_vm1, %v1084_v29  ;;  %1006 = vlog2.f32 %v475_v52  ;;  %v483_v10 = vld [vmem:[%s1402_s1 + $0x78] sm:$0xff]  ;;  %v566_v49 = vld [vmem:[#allocation2 + $0x10] sm:$0xff] }
  0x18   :  { %924 = vmatmul.mubr.msk.f32.gmra.mrb[2].mxu0 %vm79_vm0, %v66_v15  ;;  %45 = vst.msk [vmem:[#allocation3 + $0x30] sm:$0xff] %vm22_vm1, %v1084_v29  ;;  %46 = vst.msk [vmem:[#allocation3 + $0x38] sm:$0xff] %vm22_vm1, %v1084_v29  ;;  %1008 = vlog2.f32 %v474_v53 }
  0x19   :  { %926 = vmatprep.mubr.msk.f32.mxu0 %vm79_vm0, %v67_v16  ;;  %47 = vst.msk [vmem:[#allocation3 + $0x40] sm:$0xff] %vm22_vm1, %v1084_v29  ;;  %48 = vst.msk [vmem:[#allocation3 + $0x48] sm:$0xff] %vm22_vm1, %v1084_v29  ;;  %1010 = vlog2.f32 %v477_v54 }
  0x1a   :  { %49 = vst.msk [vmem:[#allocation3 + $0x50] sm:$0xff] %vm22_vm1, %v1084_v29  ;;  %50 = vst.msk [vmem:[#allocation3 + $0x58] sm:$0xff] %vm22_vm1, %v1084_v29 }
  0x1b   :  { %51 = vst.msk [vmem:[#allocation3 + $0x60] sm:$0xff] %vm22_vm1, %v1084_v29  ;;  %52 = vst.msk [vmem:[#allocation3 + $0x68] sm:$0xff] %vm22_vm1, %v1084_v29  ;;  %v995_v59 = vpop.eup %994 }
  0x1c   :  { %927 = vmatmul.mubr.msk.f32.gmra.mrb[4].mxu0 %vm79_vm0, %v68_v17  ;;  %53 = vst.msk [vmem:[#allocation3 + $0x70] sm:$0xff] %vm22_vm1, %v1084_v29  ;;  %54 = vst.msk [vmem:[#allocation3 + $0x78] sm:$0xff] %vm22_vm1, %v1084_v29  ;;  %v997_v60 = vpop.eup %996  ;;  %v519_v12 = vmul.f32 0.6931472, %v995_v59 }
  0x1d   :  { %929 = vmatprep.mubr.msk.f32.mxu0 %vm79_vm0, %v69_v18  ;;  %v999_v61 = vpop.eup %998  ;;  %v517_v14 = vmul.f32 0.6931472, %v997_v60  ;;  %v616_v53 = vld [vmem:[#allocation3 + $0x18] sm:$0xff]  ;;  %v615_v60 = vld [vmem:[#allocation3 + $0x10] sm:$0xff] }
  0x1e   :  { %v1001_v0 = vpop.eup %1000 }
  0x1f   :  { %v1003_v3 = vpop.eup %1002  ;;  %v521_v29 = vmul.f32 0.6931472, %v1001_v0 }
  0x20   :  { %930 = vmatmul.mubr.msk.f32.gmra.mrb[6].mxu0 %vm79_vm0, %v70_v19  ;;  %v1005_v4 = vpop.eup %1004  ;;  %v565_v19 = vld [vmem:[#allocation2 + $0x8] sm:$0xff] }
  0x21   :  { %932 = vmatprep.mubr.msk.f32.mxu0 %vm79_vm0, %v71_v20  ;;  %v1007_v5 = vpop.eup %1006 }
  0x22   :  { %v1009_v8 = vpop.eup %1008 }
  0x23   :  { %v1011_v11 = vpop.eup %1010  ;;  %v1301_v50 = vmul.f32 0.6931472, %v1009_v8  ;;  %v568_v8 = vld [vmem:[#allocation2 + $0x20] sm:$0xff] }
  0x24   :  { %933 = vmatmul.mubr.msk.f32.gmra.mrb[8].mxu0 %vm79_vm0, %v72_v21 }
  0x25   :  { %935 = vmatprep.mubr.msk.f32.mxu0 %vm79_vm0, %v73_v22 }
  0x28   :  { %936 = vmatmul.mubr.msk.f32.gmra.mrb[10].mxu0 %vm79_vm0, %v74_v23 }
  0x29   :  { %938 = vmatprep.mubr.msk.f32.mxu0 %vm79_vm0, %v75_v24  ;;  %v614_v24 = vld [vmem:[#allocation3 + $0x8] sm:$0xff] }
  0x2c   :  { %939 = vmatmul.mubr.msk.f32.gmra.mrb[12].mxu0 %vm79_vm0, %v76_v25  ;;  %v564_v25 = vld [vmem:[#allocation2] sm:$0xff] }
  0x2d   :  { %941 = vmatprep.mubr.msk.f32.mxu0 %vm79_vm0, %v77_v26  ;;  %v523_v26 = vmul.f32 0.6931472, %v999_v61 }
  0x30   :  { %942 = vmatmul.mubr.msk.f32.gmra.mrb[14].mxu0 %vm79_vm0, %v78_v27 }
  0xe7   :  { %v922_v30 = vpop.f32.mrb[0].mxu0 }
  0xe8   :  { %v194_v31 = vpop.f32.mrb[1].mxu0 }
  0xe9   :  { %946 = vmatprep.mubr.msk.f32.mxu1 %vm274_vm2, %v194_v31  ;;  %v525_v31 = vmul.f32 0.6931472, %v1005_v4 }
  0xea   :  { %947 = vmatmul.mubr.msk.f32.vlgmr.msra.gmra.mrb[0].mxu1 %vm274_vm2, %v922_v30  ;;  %v527_v30 = vmul.f32 0.6931472, %v1003_v3 }
  0xeb   :  { %v925_v32 = vpop.f32.mrb[2].mxu0 }
  0xec   :  { %v204_v33 = vpop.f32.mrb[3].mxu0 }
  0xed   :  { %949 = vmatprep.mubr.msk.f32.mxu1 %vm274_vm2, %v204_v33 }
  0xee   :  { %950 = vmatmul.mubr.msk.f32.gmra.mrb[2].mxu1 %vm274_vm2, %v925_v32 }
  0xef   :  { %v928_v34 = vpop.f32.mrb[4].mxu0 }
  0xf0   :  { %v214_v35 = vpop.f32.mrb[5].mxu0 }
  0xf1   :  { %952 = vmatprep.mubr.msk.f32.mxu1 %vm274_vm2, %v214_v35  ;;  %v613_v35 = vld [vmem:[#allocation3] sm:$0xff] }
  0xf2   :  { %953 = vmatmul.mubr.msk.f32.gmra.mrb[4].mxu1 %vm274_vm2, %v928_v34 }
  0xf3   :  { %v931_v36 = vpop.f32.mrb[6].mxu0 }
  0xf4   :  { %v224_v37 = vpop.f32.mrb[7].mxu0 }
  0xf5   :  { %955 = vmatprep.mubr.msk.f32.mxu1 %vm274_vm2, %v224_v37  ;;  %v1295_v37 = vmul.f32 0.6931472, %v1007_v5 }
  0xf6   :  { %956 = vmatmul.mubr.msk.f32.gmra.mrb[6].mxu1 %vm274_vm2, %v931_v36 }
  0xf7   :  { %v934_v38 = vpop.f32.mrb[8].mxu0 }
  0xf8   :  { %v234_v39 = vpop.f32.mrb[9].mxu0 }
  0xf9   :  { %958 = vmatprep.mubr.msk.f32.mxu1 %vm274_vm2, %v234_v39 }
  0xfa   :  { %959 = vmatmul.mubr.msk.f32.gmra.mrb[8].mxu1 %vm274_vm2, %v934_v38 }
  0xfb   :  { %v937_v40 = vpop.f32.mrb[10].mxu0 }
  0xfc   :  { %v244_v41 = vpop.f32.mrb[11].mxu0 }
  0xfd   :  { %961 = vmatprep.mubr.msk.f32.mxu1 %vm274_vm2, %v244_v41 }
  0xfe   :  { %962 = vmatmul.mubr.msk.f32.gmra.mrb[10].mxu1 %vm274_vm2, %v937_v40 }
  0xff   :  { %v940_v42 = vpop.f32.mrb[12].mxu0 }
 0x100   :  { %v254_v43 = vpop.f32.mrb[13].mxu0 }
 0x101   :  { %964 = vmatprep.mubr.msk.f32.mxu1 %vm274_vm2, %v254_v43 }
 0x102   :  { %965 = vmatmul.mubr.msk.f32.gmra.mrb[12].mxu1 %vm274_vm2, %v940_v42  ;;  %v567_v42 = vld [vmem:[#allocation2 + $0x18] sm:$0xff] }
 0x103   :  { %v943_v44 = vpop.f32.mrb[14].mxu0 }
 0x104   :  { %v264_v45 = vpop.f32.mrb[15].mxu0 }
 0x105   :  { %967 = vmatprep.mubr.msk.f32.mxu1 %vm274_vm2, %v264_v45  ;;  %v482_v45 = vld [vmem:[%s1402_s1 + $0x70] sm:$0xff] }
 0x106   :  { %968 = vmatmul.mubr.msk.f32.gmra.mrb[14].mxu1 %vm274_vm2, %v943_v44 }
 0x1bd   :  { %v948_v55 = vpop.f32.mrb[0].mxu1 }
 0x1be   :  { %1012 = vlog2.f32 %v948_v55  ;;  %v389_v57 = vpop.f32.mrb[1].mxu1  ;;  %v1304_v55 = vmul.f32 0.6931472, %v1011_v11 }
 0x1bf   :  { %1014 = vlog2.f32 %v389_v57 }
 0x1c0   :  { %1016 = vlog2.f32 %v476_v56 }
 0x1c1   :  { %v951_v62 = vpop.f32.mrb[2].mxu1  ;;  %1018 = vlog2.f32 %v479_v58 }
 0x1c2   :  { %1020 = vlog2.f32 %v951_v62  ;;  %v399_v1 = vpop.f32.mrb[3].mxu1 }
 0x1c3   :  { %1022 = vlog2.f32 %v399_v1 }
 0x1c4   :  { %1024 = vlog2.f32 %v478_v63 }
 0x1c5   :  { %v954_v6 = vpop.f32.mrb[4].mxu1  ;;  %1026 = vlog2.f32 %v481_v2  ;;  %v569_v2 = vld [vmem:[#allocation2 + $0x28] sm:$0xff] }
 0x1c6   :  { %1028 = vlog2.f32 %v954_v6  ;;  %v409_v9 = vpop.f32.mrb[5].mxu1 }
 0x1c7   :  { %1030 = vlog2.f32 %v409_v9 }
 0x1c8   :  { %v1013_v13 = vpop.eup %1012  ;;  %1032 = vlog2.f32 %v480_v7 }
 0x1c9   :  { %v1015_v15 = vpop.eup %1014  ;;  %v487_v16 = vmul.f32 0.6931472, %v1013_v13  ;;  %v957_v17 = vpop.f32.mrb[6].mxu1  ;;  %1034 = vlog2.f32 %v483_v10 }
 0x1ca   :  { %v1017_v18 = vpop.eup %1016  ;;  %v485_v20 = vmul.f32 0.6931472, %v1015_v15  ;;  %1036 = vlog2.f32 %v957_v17  ;;  %v419_v21 = vpop.f32.mrb[7].mxu1 }
 0x1cb   :  { %v1019_v22 = vpop.eup %1018  ;;  %v549_v23 = vsub.f32 %v487_v16, %v519_v12  ;;  %1038 = vlog2.f32 %v419_v21  ;;  %v1306_v56 = vmul.f32 0.6931472, %v1017_v18  ;;  %v618_v12 = vld [vmem:[#allocation3 + $0x28] sm:$0xff] }
 0x1cc   :  { %v1021_v27 = vpop.eup %1020  ;;  %v548_v28 = vsub.f32 %v485_v20, %v517_v14  ;;  %v1311_v9 = vmul.f32 0.6931472, %v1019_v22 }
 0x1cd   :  { %v1023_v32 = vpop.eup %1022  ;;  %v581_v33 = vadd.f32 %v565_v19, %v549_v23  ;;  %v630_v34 = vmul.f32 %v549_v23, %v549_v23  ;;  %v491_v36 = vmul.f32 0.6931472, %v1021_v27  ;;  %v960_v38 = vpop.f32.mrb[8].mxu1  ;;  %v617_v19 = vld [vmem:[#allocation3 + $0x20] sm:$0xff] }
 0x1ce   :  { %v1025_v39 = vpop.eup %1024  ;;  %v580_v40 = vadd.f32 %v564_v25, %v548_v28  ;;  %v629_v41 = vmul.f32 %v548_v28, %v548_v28  ;;  %v489_v43 = vmul.f32 0.6931472, %v1023_v32  ;;  %1040 = vlog2.f32 %v960_v38  ;;  %v429_v44 = vpop.f32.mrb[9].mxu1  ;;  %v571_v25 = vld [vmem:[#allocation2 + $0x38] sm:$0xff] }
 0x1cf   :  { %v1027_v46 = vpop.eup %1026  ;;  %598 = vst.msk [vmem:[#allocation2 + $0x8] sm:$0xff] %vm22_vm1, %v581_v33  ;;  %v646_v47 = vadd.f32 %v630_v34, %v614_v24  ;;  %v551_v48 = vsub.f32 %v491_v36, %v523_v26  ;;  %1042 = vlog2.f32 %v429_v44  ;;  %v1314_v14 = vmul.f32 0.6931472, %v1025_v39  ;;  %v620_v36 = vld [vmem:[#allocation3 + $0x38] sm:$0xff] }
 0x1d0   :  { %v1029_v51 = vpop.eup %1028  ;;  %597 = vst.msk [vmem:[#allocation2] sm:$0xff] %vm22_vm1, %v580_v40  ;;  %v645_v52 = vadd.f32 %v629_v41, %v613_v35  ;;  %v550_v54 = vsub.f32 %v489_v43, %v521_v29  ;;  %1044 = vlog2.f32 %v482_v45  ;;  %v1316_v15 = vmul.f32 0.6931472, %v1027_v46  ;;  %v619_v43 = vld [vmem:[#allocation3 + $0x30] sm:$0xff] }
 0x1d1   :  { %v1031_v57 = vpop.eup %1030  ;;  %662 = vst.msk [vmem:[#allocation3 + $0x8] sm:$0xff] %vm22_vm1, %v646_v47  ;;  %v583_v58 = vadd.f32 %v567_v42, %v551_v48  ;;  %v632_v59 = vmul.f32 %v551_v48, %v551_v48  ;;  %v495_v61 = vmul.f32 0.6931472, %v1029_v51  ;;  %v963_v62 = vpop.f32.mrb[10].mxu1  ;;  %v573_v51 = vld [vmem:[#allocation2 + $0x48] sm:$0xff] }
 0x1d2   :  { %v1033_v63 = vpop.eup %1032  ;;  %661 = vst.msk [vmem:[#allocation3] sm:$0xff] %vm22_vm1, %v645_v52  ;;  %v582_v0 = vadd.f32 %v566_v49, %v550_v54  ;;  %v631_v1 = vmul.f32 %v550_v54, %v550_v54  ;;  %v493_v3 = vmul.f32 0.6931472, %v1031_v57  ;;  %1046 = vlog2.f32 %v963_v62  ;;  %v439_v4 = vpop.f32.mrb[11].mxu1 }
 0x1d3   :  { %v1035_v5 = vpop.eup %1034  ;;  %600 = vst.msk [vmem:[#allocation2 + $0x18] sm:$0xff] %vm22_vm1, %v583_v58  ;;  %v648_v6 = vadd.f32 %v632_v59, %v616_v53  ;;  %v553_v7 = vsub.f32 %v495_v61, %v527_v30  ;;  %1048 = vlog2.f32 %v439_v4  ;;  %v1319_v22 = vmul.f32 0.6931472, %v1033_v63  ;;  %v572_v59 = vld [vmem:[#allocation2 + $0x40] sm:$0xff] }
 0x1d4   :  { %v1037_v10 = vpop.eup %1036  ;;  %599 = vst.msk [vmem:[#allocation2 + $0x10] sm:$0xff] %vm22_vm1, %v582_v0  ;;  %v647_v11 = vadd.f32 %v631_v1, %v615_v60  ;;  %v552_v13 = vsub.f32 %v493_v3, %v525_v31  ;;  %v570_v31 = vld [vmem:[#allocation2 + $0x30] sm:$0xff]  ;;  %v1327_v39 = vmul.f32 0.6931472, %v1035_v5  ;;  %v622_v1 = vld [vmem:[#allocation3 + $0x48] sm:$0xff] }
 0x1d5   :  { %v1039_v16 = vpop.eup %1038  ;;  %664 = vst.msk [vmem:[#allocation3 + $0x18] sm:$0xff] %vm22_vm1, %v648_v6  ;;  %v585_v17 = vadd.f32 %v569_v2, %v553_v7  ;;  %v634_v18 = vmul.f32 %v553_v7, %v553_v7  ;;  %v499_v20 = vmul.f32 0.6931472, %v1037_v10  ;;  %v966_v21 = vpop.f32.mrb[12].mxu1  ;;  %v621_v7 = vld [vmem:[#allocation3 + $0x40] sm:$0xff] }
 0x1d6   :  { %663 = vst.msk [vmem:[#allocation3 + $0x10] sm:$0xff] %vm22_vm1, %v647_v11  ;;  %v584_v23 = vadd.f32 %v568_v8, %v552_v13  ;;  %v633_v24 = vmul.f32 %v552_v13, %v552_v13  ;;  %v497_v26 = vmul.f32 0.6931472, %v1039_v16  ;;  %1050 = vlog2.f32 %v966_v21  ;;  %v449_v27 = vpop.f32.mrb[13].mxu1  ;;  %v681_v28 = vld [vmem:[#allocation2 + $0x8] sm:$0xff]  ;;  %v575_v13 = vld [vmem:[#allocation2 + $0x58] sm:$0xff] }
 0x1d7   :  { %602 = vst.msk [vmem:[#allocation2 + $0x28] sm:$0xff] %vm22_vm1, %v585_v17  ;;  %v650_v29 = vadd.f32 %v634_v18, %v618_v12  ;;  %v555_v30 = vsub.f32 %v499_v20, %v1295_v37  ;;  %1052 = vlog2.f32 %v449_v27  ;;  %v680_v32 = vld [vmem:[#allocation2] sm:$0xff]  ;;  %v697_v33 = vsel %vm22_vm1, %v681_v28, 0.0  ;;  %v574_v20 = vld [vmem:[#allocation2 + $0x50] sm:$0xff]  ;;  %v624_v28 = vld [vmem:[#allocation3 + $0x58] sm:$0xff] }
 0x1d8   :  { %v1041_v34 = vpop.eup %1040  ;;  %601 = vst.msk [vmem:[#allocation2 + $0x20] sm:$0xff] %vm22_vm1, %v584_v23  ;;  %v649_v35 = vadd.f32 %v633_v24, %v617_v19  ;;  %v554_v38 = vsub.f32 %v497_v26, %v1301_v50  ;;  %v696_v40 = vsel %vm22_vm1, %v680_v32, 0.0  ;;  %v737_v62 = vld [vmem:[#allocation3 + $0x8] sm:$0xff] }
 0x1d9   :  { %v1043_v41 = vpop.eup %1042  ;;  %666 = vst.msk [vmem:[#allocation3 + $0x28] sm:$0xff] %vm22_vm1, %v650_v29  ;;  %v587_v37 = vadd.f32 %v571_v25, %v555_v30  ;;  %v636_v42 = vmul.f32 %v555_v30, %v555_v30  ;;  %v503_v44 = vmul.f32 0.6931472, %v1041_v34  ;;  %v969_v45 = vpop.f32.mrb[14].mxu1  ;;  %v698_v46 = vadd.f32 %v697_v33, %v696_v40  ;;  %v736_v47 = vld [vmem:[#allocation3] sm:$0xff]  ;;  %v623_v34 = vld [vmem:[#allocation3 + $0x50] sm:$0xff] }
 0x1da   :  { %665 = vst.msk [vmem:[#allocation3 + $0x20] sm:$0xff] %vm22_vm1, %v649_v35  ;;  %v586_v48 = vadd.f32 %v570_v31, %v554_v38  ;;  %v635_v49 = vmul.f32 %v554_v38, %v554_v38  ;;  %v501_v50 = vmul.f32 0.6931472, %v1043_v41  ;;  %1054 = vlog2.f32 %v969_v45  ;;  %v459_v52 = vpop.f32.mrb[15].mxu1  ;;  %v683_v53 = vld [vmem:[#allocation2 + $0x18] sm:$0xff]  ;;  %v1045_v54 = vpop.eup %1044  ;;  %v577_v41 = vld [vmem:[#allocation2 + $0x68] sm:$0xff] }
 0x1db   :  { %604 = vst.msk [vmem:[#allocation2 + $0x38] sm:$0xff] %vm22_vm1, %v587_v37  ;;  %v652_v57 = vadd.f32 %v636_v42, %v620_v36  ;;  %v557_v58 = vsub.f32 %v503_v44, %v1304_v55  ;;  %1056 = vlog2.f32 %v459_v52  ;;  %v682_v60 = vld [vmem:[#allocation2 + $0x10] sm:$0xff]  ;;  %v701_v61 = vsel %vm22_vm1, %v683_v53, 0.0  ;;  %v576_v44 = vld [vmem:[#allocation2 + $0x60] sm:$0xff] }
 0x1dc   :  { %v1047_v63 = vpop.eup %1046  ;;  %603 = vst.msk [vmem:[#allocation2 + $0x30] sm:$0xff] %vm22_vm1, %v586_v48  ;;  %v651_v0 = vadd.f32 %v635_v49, %v619_v43  ;;  %v556_v2 = vsub.f32 %v501_v50, %v1306_v56  ;;  %v699_v3 = vsel %vm22_vm1, %v682_v60, 0.0  ;;  %v752_v4 = vsel %vm22_vm1, %v736_v47, 0.0  ;;  %v626_v50 = vld [vmem:[#allocation3 + $0x68] sm:$0xff] }
 0x1dd   :  { %v1049_v5 = vpop.eup %1048  ;;  %668 = vst.msk [vmem:[#allocation3 + $0x38] sm:$0xff] %vm22_vm1, %v652_v57  ;;  %v589_v55 = vadd.f32 %v573_v51, %v557_v58  ;;  %v638_v6 = vmul.f32 %v557_v58, %v557_v58  ;;  %v507_v8 = vmul.f32 0.6931472, %v1047_v63  ;;  %v700_v10 = vadd.f32 %v699_v3, %v698_v46  ;;  %v738_v25 = vld [vmem:[#allocation3 + $0x10] sm:$0xff]  ;;  %v739_v57 = vld [vmem:[#allocation3 + $0x18] sm:$0xff] }
 0x1de   :  { %667 = vst.msk [vmem:[#allocation3 + $0x30] sm:$0xff] %vm22_vm1, %v651_v0  ;;  %v588_v11 = vadd.f32 %v572_v59, %v556_v2  ;;  %v637_v12 = vmul.f32 %v556_v2, %v556_v2  ;;  %v505_v16 = vmul.f32 0.6931472, %v1049_v5  ;;  %v685_v17 = vld [vmem:[#allocation2 + $0x28] sm:$0xff]  ;;  %v753_v56 = vsel %vm22_vm1, %v737_v62, 0.0 }
 0x1df   :  { %606 = vst.msk [vmem:[#allocation2 + $0x48] sm:$0xff] %vm22_vm1, %v589_v55  ;;  %v654_v18 = vadd.f32 %v638_v6, %v622_v1  ;;  %v559_v19 = vsub.f32 %v507_v8, %v1311_v9  ;;  %v684_v21 = vld [vmem:[#allocation2 + $0x20] sm:$0xff]  ;;  %v702_v23 = vadd.f32 %v701_v61, %v700_v10  ;;  %v705_v24 = vsel %vm22_vm1, %v685_v17, 0.0  ;;  %v579_v1 = vld [vmem:[#allocation2 + $0x78] sm:$0xff]  ;;  %v578_v55 = vld [vmem:[#allocation2 + $0x70] sm:$0xff] }
 0x1e0   :  { %v1051_v26 = vpop.eup %1050  ;;  %605 = vst.msk [vmem:[#allocation2 + $0x40] sm:$0xff] %vm22_vm1, %v588_v11  ;;  %v653_v27 = vadd.f32 %v637_v12, %v621_v7  ;;  %v558_v29 = vsub.f32 %v505_v16, %v1314_v14  ;;  %v703_v30 = vsel %vm22_vm1, %v684_v21, 0.0  ;;  %v754_v31 = vadd.f32 %v753_v56, %v752_v4  ;;  %v628_v12 = vld [vmem:[#allocation3 + $0x78] sm:$0xff]  ;;  %v741_v17 = vld [vmem:[#allocation3 + $0x28] sm:$0xff] }
 0x1e1   :  { %v1053_v32 = vpop.eup %1052  ;;  %670 = vst.msk [vmem:[#allocation3 + $0x48] sm:$0xff] %vm22_vm1, %v654_v18  ;;  %v591_v9 = vadd.f32 %v575_v13, %v559_v19  ;;  %v640_v33 = vmul.f32 %v559_v19, %v559_v19  ;;  %v511_v35 = vmul.f32 0.6931472, %v1051_v26  ;;  %v704_v36 = vadd.f32 %v703_v30, %v702_v23  ;;  %v740_v3 = vld [vmem:[#allocation3 + $0x20] sm:$0xff] }
 0x1e2   :  { %669 = vst.msk [vmem:[#allocation3 + $0x40] sm:$0xff] %vm22_vm1, %v653_v27  ;;  %v590_v38 = vadd.f32 %v574_v20, %v558_v29  ;;  %v639_v40 = vmul.f32 %v558_v29, %v558_v29  ;;  %v509_v37 = vmul.f32 0.6931472, %v1053_v32  ;;  %v755_v42 = vsel %vm22_vm1, %v738_v25, 0.0  ;;  %v687_v47 = vld [vmem:[#allocation2 + $0x38] sm:$0xff]  ;;  %v627_v20 = vld [vmem:[#allocation3 + $0x70] sm:$0xff] }
 0x1e3   :  { %608 = vst.msk [vmem:[#allocation2 + $0x58] sm:$0xff] %vm22_vm1, %v591_v9  ;;  %v656_v14 = vadd.f32 %v640_v33, %v624_v28  ;;  %v561_v43 = vsub.f32 %v511_v35, %v1316_v15  ;;  %v545_v45 = vmul.f32 0.6931472, %v1045_v54  ;;  %v686_v46 = vld [vmem:[#allocation2 + $0x30] sm:$0xff]  ;;  %v706_v48 = vadd.f32 %v705_v24, %v704_v36  ;;  %v625_v54 = vld [vmem:[#allocation3 + $0x60] sm:$0xff] }
 0x1e4   :  { %v1055_v49 = vpop.eup %1054  ;;  %607 = vst.msk [vmem:[#allocation2 + $0x50] sm:$0xff] %vm22_vm1, %v590_v38  ;;  %v655_v51 = vadd.f32 %v639_v40, %v623_v34  ;;  %v560_v52 = vsub.f32 %v509_v37, %v1319_v22  ;;  %v707_v53 = vsel %vm22_vm1, %v686_v46, 0.0  ;;  %v756_v58 = vadd.f32 %v755_v42, %v754_v31  ;;  %v743_v35 = vld [vmem:[#allocation3 + $0x38] sm:$0xff] }
 0x1e5   :  { %v1057_v59 = vpop.eup %1056  ;;  %672 = vst.msk [vmem:[#allocation3 + $0x58] sm:$0xff] %vm22_vm1, %v656_v14  ;;  %v593_v15 = vadd.f32 %v577_v41, %v561_v43  ;;  %v642_v60 = vmul.f32 %v561_v43, %v561_v43  ;;  %v515_v61 = vmul.f32 0.6931472, %v1055_v49  ;;  %v708_v62 = vadd.f32 %v707_v53, %v706_v48  ;;  %v742_v56 = vld [vmem:[#allocation3 + $0x30] sm:$0xff] }
 0x1e6   :  { %671 = vst.msk [vmem:[#allocation3 + $0x50] sm:$0xff] %vm22_vm1, %v655_v51  ;;  %v592_v63 = vadd.f32 %v576_v44, %v560_v52  ;;  %v641_v0 = vmul.f32 %v560_v52, %v560_v52  ;;  %v513_v2 = vmul.f32 0.6931472, %v1057_v59  ;;  %v709_v22 = vsel %vm22_vm1, %v687_v47, 0.0  ;;  %v689_v7 = vld [vmem:[#allocation2 + $0x48] sm:$0xff] }
 0x1e7   :  { %610 = vst.msk [vmem:[#allocation2 + $0x68] sm:$0xff] %vm22_vm1, %v593_v15  ;;  %v658_v4 = vadd.f32 %v642_v60, %v626_v50  ;;  %v563_v5 = vsub.f32 %v515_v61, %v1327_v39  ;;  %v688_v6 = vld [vmem:[#allocation2 + $0x40] sm:$0xff]  ;;  %v710_v8 = vadd.f32 %v709_v22, %v708_v62  ;;  %v757_v10 = vsel %vm22_vm1, %v739_v57, 0.0 }
 0x1e8   :  { %609 = vst.msk [vmem:[#allocation2 + $0x60] sm:$0xff] %vm22_vm1, %v592_v63  ;;  %v657_v11 = vadd.f32 %v641_v0, %v625_v54  ;;  %v562_v13 = vsub.f32 %v513_v2, %v545_v45  ;;  %v711_v16 = vsel %vm22_vm1, %v688_v6, 0.0  ;;  %v758_v18 = vadd.f32 %v757_v10, %v756_v58  ;;  %v745_v47 = vld [vmem:[#allocation3 + $0x48] sm:$0xff] }
 0x1e9   :  { %674 = vst.msk [vmem:[#allocation3 + $0x68] sm:$0xff] %vm22_vm1, %v658_v4  ;;  %v595_v19 = vadd.f32 %v579_v1, %v563_v5  ;;  %v644_v39 = vmul.f32 %v563_v5, %v563_v5  ;;  %v712_v21 = vadd.f32 %v711_v16, %v710_v8  ;;  %v759_v23 = vsel %vm22_vm1, %v740_v3, 0.0  ;;  %v744_v36 = vld [vmem:[#allocation3 + $0x40] sm:$0xff] }
 0x1ea   :  { %673 = vst.msk [vmem:[#allocation3 + $0x60] sm:$0xff] %vm22_vm1, %v657_v11  ;;  %v594_v24 = vadd.f32 %v578_v55, %v562_v13  ;;  %v643_v25 = vmul.f32 %v562_v13, %v562_v13  ;;  %v713_v26 = vsel %vm22_vm1, %v689_v7, 0.0  ;;  %v760_v27 = vadd.f32 %v759_v23, %v758_v18  ;;  %v691_v30 = vld [vmem:[#allocation2 + $0x58] sm:$0xff] }
 0x1eb   :  { %612 = vst.msk [vmem:[#allocation2 + $0x78] sm:$0xff] %vm22_vm1, %v595_v19  ;;  %v660_v28 = vadd.f32 %v644_v39, %v628_v12  ;;  %v690_v29 = vld [vmem:[#allocation2 + $0x50] sm:$0xff]  ;;  %v714_v31 = vadd.f32 %v713_v26, %v712_v21  ;;  %v761_v32 = vsel %vm22_vm1, %v741_v17, 0.0  ;;  %v763_v9 = vsel %vm22_vm1, %v742_v56, 0.0 }
 0x1ec   :  { %611 = vst.msk [vmem:[#allocation2 + $0x70] sm:$0xff] %vm22_vm1, %v594_v24  ;;  %v659_v33 = vadd.f32 %v643_v25, %v627_v20  ;;  %v715_v34 = vsel %vm22_vm1, %v690_v29, 0.0  ;;  %v762_v38 = vadd.f32 %v761_v32, %v760_v27  ;;  %v717_v41 = vsel %vm22_vm1, %v691_v30, 0.0  ;;  %v747_v54 = vld [vmem:[#allocation3 + $0x58] sm:$0xff] }
 0x1ed   :  { %676 = vst.msk [vmem:[#allocation3 + $0x78] sm:$0xff] %vm22_vm1, %v660_v28  ;;  %v716_v40 = vadd.f32 %v715_v34, %v714_v31  ;;  %v765_v44 = vsel %vm22_vm1, %v743_v35, 0.0  ;;  %v767_v45 = vsel %vm22_vm1, %v744_v36, 0.0  ;;  %v746_v48 = vld [vmem:[#allocation3 + $0x50] sm:$0xff]  ;;  %v769_v59 = vsel %vm22_vm1, %v745_v47, 0.0 }
 0x1ee   :  { %675 = vst.msk [vmem:[#allocation3 + $0x70] sm:$0xff] %vm22_vm1, %v659_v33  ;;  %v764_v37 = vadd.f32 %v763_v9, %v762_v38  ;;  %v693_v14 = vld [vmem:[#allocation2 + $0x68] sm:$0xff]  ;;  %v771_v15 = vsel %vm22_vm1, %v746_v48, 0.0  ;;  %v773_v22 = vsel %vm22_vm1, %v747_v54, 0.0 }
 0x1ef   :  { %v692_v42 = vld [vmem:[#allocation2 + $0x60] sm:$0xff]  ;;  %v718_v43 = vadd.f32 %v717_v41, %v716_v40  ;;  %v721_v50 = vsel %vm22_vm1, %v693_v14, 0.0 }
 0x1f0   :  { %v719_v46 = vsel %vm22_vm1, %v692_v42, 0.0  ;;  %v766_v49 = vadd.f32 %v765_v44, %v764_v37  ;;  %v749_v4 = vld [vmem:[#allocation3 + $0x68] sm:$0xff] }
 0x1f1   :  { %v720_v51 = vadd.f32 %v719_v46, %v718_v43  ;;  %v748_v61 = vld [vmem:[#allocation3 + $0x60] sm:$0xff]  ;;  %v777_v7 = vsel %vm22_vm1, %v749_v4, 0.0 }
 0x1f2   :  { %v768_v52 = vadd.f32 %v767_v45, %v766_v49  ;;  %v695_v57 = vld [vmem:[#allocation2 + $0x78] sm:$0xff]  ;;  %v775_v3 = vsel %vm22_vm1, %v748_v61, 0.0 }
 0x1f3   :  { %v694_v53 = vld [vmem:[#allocation2 + $0x70] sm:$0xff]  ;;  %v722_v58 = vadd.f32 %v721_v50, %v720_v51  ;;  %v725_v0 = vsel %vm22_vm1, %v695_v57, 0.0 }
 0x1f4   :  { %v723_v60 = vsel %vm22_vm1, %v694_v53, 0.0  ;;  %v770_v62 = vadd.f32 %v769_v59, %v768_v52  ;;  %v751_v10 = vld [vmem:[#allocation3 + $0x78] sm:$0xff] }
 0x1f5   :  { %v724_v63 = vadd.f32 %v723_v60, %v722_v58  ;;  %v750_v5 = vld [vmem:[#allocation3 + $0x70] sm:$0xff]  ;;  %v781_v13 = vsel %vm22_vm1, %v751_v10, 0.0 }
 0x1f6   :  { %v772_v1 = vadd.f32 %v771_v15, %v770_v62  ;;  %v779_v8 = vsel %vm22_vm1, %v750_v5, 0.0 }
 0x1f7   :  { %v726_v2 = vadd.f32 %v725_v0, %v724_v63 }
 0x1f8   :  { %v774_v55 = vadd.f32 %v773_v22, %v772_v1 }
 0x1f9   :  { %727 = vadd.xlane.f32.xlu0 %v726_v2 }
 0x1fa   :  { %v776_v6 = vadd.f32 %v775_v3, %v774_v55 }
 0x1fc   :  { %v778_v11 = vadd.f32 %v777_v7, %v776_v6 }
 0x1fe   :  { %v780_v12 = vadd.f32 %v779_v8, %v778_v11 }
 0x200   :  { %v782_v16 = vadd.f32 %v781_v13, %v780_v12 }
 0x202   :  { %783 = vadd.xlane.f32.xlu0 %v782_v16 }
 0x286   :  { %v728_v17 = vpop.xlane.xlu0 %727 }
 0x287   :  { %v729_v56 = vrot.slane %v728_v17, 4 }
 0x289   :  { %v730_v18 = vadd.f32 %v729_v56, %v728_v17 }
 0x28b   :  { %v731_v19 = vrot.slane %v730_v18, 2 }
 0x28d   :  { %v732_v39 = vadd.f32 %v731_v19, %v730_v18 }
 0x28f   :  { %v784_v20 = vpop.xlane.xlu0 %783  ;;  %v733_v21 = vrot.slane %v732_v39, 1 }
 0x290   :  { %v785_v23 = vrot.slane %v784_v20, 4 }
 0x291   :  { %v734_v24 = vadd.f32 %v733_v21, %v732_v39 }
 0x292   :  { %v786_v25 = vadd.f32 %v785_v23, %v784_v20 }
 0x293   :  { %986 = vpush %v734_v24 }
 0x294   :  { %v787_v26 = vrot.slane %v786_v25, 2 }
 0x296   :  { %v788_v27 = vadd.f32 %v787_v26, %v786_v25 }
 0x298   :  { %v789_v28 = vrot.slane %v788_v27, 1 }
 0x29a   :  { %v790_v29 = vadd.f32 %v789_v28, %v788_v27 }
 0x29c   :  { %988 = vpush %v790_v29 }
 0x2c4   :  { %s987_s1 = spop %986 }
 0x2c5   :  { %s794_s12 = smul.f32 0.00048828125, %s987_s1 }
 0x2c7   :  { %s795_s13 = smul.f32 2048.0, %s794_s12 }
 0x2c8   :  { %s801_s15 = smul.f32 0.15, %s794_s12 }
 0x2c9   :  { %s796_s14 = smul.f32 %s795_s13, %s794_s12 }
 0x2ca   :  { %s802_s18 = smul.f32 %s801_s15, %s794_s12 }
 0x2cd   :  { %s989_s16 = spop %988 }
 0x2ce   :  { %s797_s17 = ssub.f32 %s989_s16, %s796_s14 }
 0x2d0   :  { %s800_s19 = smul.f32 0.0004885198, %s797_s17 }
 0x2d2   :  { %s803_s20 = sadd.f32 %s802_s18, %s800_s19 }
 0x2d4   :  { %v804_v30 = vstv %s803_s20 }
 0x2d5   :  { %1058 = vrsqrt.f32 %v804_v30  ;;  %vm807_vm3 = vcmp.eq.f32.partialorder %v804_v30, inf  ;;  %v810_v9 = vand.u32 2147483648, %v804_v30  ;;  %vm809_vm4 = vcmp.eq.f32.partialorder %v804_v30, 0.0 }
 0x2df   :  { %v1059_v31 = vpop.eup %1058 }
 0x2e0   :  { %v806_v32 = vmul.f32 %v1059_v31, %v804_v30 }
 0x2e2   :  { %v808_v33 = vsel %vm807_vm3, %v804_v30, %v806_v32 }
 0x2e3   :  { %v811_v34 = vsel %vm809_vm4, %v810_v9, %v808_v33 }
 0x2e4   :  { %990 = vpush %v811_v34 }
 0x315   :  { %s991_s23 = spop %990 }
 0x316   :  { %v813_v35 = vstv %s991_s23 }
 0x317   :  { %816 = vst.msk [vmem:[#allocation4] sm:$0x1] %vm815_vm5, %v813_v35 }
 0x318   :  { %1071 = shalt.err (!%p1068_p4)
}
 0x319   :  { %s1072_s28 = scalar_lea.hbm %s1405_s4, 16 }
 0x31a   :  { %p1073_p5 = scmp.ne.s32.totalorder %s1405_s4, %s1072_s28  ;;  %p1076_p6 = scmp.lt.u32.totalorder %s1072_s28, %s1405_s4 }
 0x31c   :  { %p1078_p7 = pnand %p1076_p6, %p1073_p5 }
 0x31e   :  { %1081 = shalt.err (!%p1078_p7)
}
 0x31f   :  { %826 = dma.vmem_to_hbm [thread:$0]  %s824_s22, 16, %s1405_s4, [#allocation5]  }
 0x320   :  { %1082 = dma.done.wait [#allocation5], 16  }
 0x321   :  { %1083 = vsyncadd [#allocation5], 4294967280 }
 0x322   :  { %830 = vsyncpa [#allocation5], 1 }

</bundles_post_ra>
